<compile_context>
chip_gen: v5e
topology: v5e:2x2
jax: 0.10.0
libtpu: 0.0.40
codegen_flags: <defaults>
</compile_context>

<pallas_src>
import functools

import numpy as np
import jax
import jax.numpy as jnp
from jax import lax
from jax.experimental import pallas as pl
from jax.experimental.pallas import tpu as pltpu


def _round_up(x, m):
    return ((x + m - 1) // m) * m


# ----------------------------------------------------------------------------
# Kernel
# ----------------------------------------------------------------------------
def _aux_encoder_kernel(packed_ref, c_ref, g_ref, worg_ref, wrbf_ref, out_ref,
                        *, cph_count, bias_lane):
    tb = out_ref.shape[0]
    v_pad = worg_ref.shape[0]
    c_all = wrbf_ref.shape[0]
    mxu_dtype = worg_ref.dtype

    packed = packed_ref[...]                                    # (TB, 4) f32
    ids = packed[:, 0:1]                                        # integer-valued f32
    ph = packed[:, 1:2]
    temp = packed[:, 2:3]

    # Organism one-hot over the padded vocab, plus the reserved bias lane.
    # NOTE: ids must be < v_pad (v_pad=128, vocab=17 here); out-of-range ids
    # would silently contribute a zero embedding.
    iota_v = lax.broadcasted_iota(jnp.int32, (tb, v_pad), 1)
    onehot = jnp.logical_or(iota_v.astype(jnp.float32) == ids,
                            iota_v == bias_lane).astype(mxu_dtype)

    # Fused pH/temperature RBF: one subtract/square/exp over a single 256-lane
    # segment; per-lane center and gamma rows, per-lane pH-vs-temp select.
    lane = lax.broadcasted_iota(jnp.int32, (tb, c_all), 1)
    x = jnp.where(lane < cph_count, ph, temp)                   # (TB, C_all) f32
    rbf = jnp.exp(-g_ref[...] * jnp.square(x - c_ref[...]))     # f32 on VPU/EUP

    # Two MXU matmuls (no lhs concatenate copy), f32 accumulation, narrow-N (=E)
    # output so the writeback is exactly the bytes the module produces.
    acc = jnp.dot(onehot, worg_ref[...], preferred_element_type=jnp.float32)
    acc = acc + jnp.dot(rbf.astype(mxu_dtype), wrbf_ref[...],
                        preferred_element_type=jnp.float32)
    out_ref[...] = acc                                          # (TB, E) f32


# ----------------------------------------------------------------------------
# Tiling / wrapper
# ----------------------------------------------------------------------------
def _pick_tiling(batch, block_b):
    """Batch tile (multiple of 16 for bf16 sublane packing) and padded batch."""
    block_b = max(16, _round_up(block_b, 16))
    n_steps = -(-batch // block_b)            # ceil
    if batch > 256:
        n_steps = max(n_steps, 2)             # give both v7x TensorCores work
    tb = max(16, _round_up(-(-batch // n_steps), 16))
    return tb, tb * n_steps


def auxiliary_encoder(organism, ph, temperature, fused, *, block_b=2048):
    """organism: (B,) int32 ids; ph/temperature: (B,) float32. Returns (B, E)."""
    B = organism.shape[0]
    E = int(fused["e"])
    c_all = fused["c"].shape[1]
    v_pad = fused["w_org"].shape[0]
    w_itemsize = jnp.dtype(fused["w_org"].dtype).itemsize

    tb, b_pad = _pick_tiling(B, block_b)
    grid = (b_pad // tb,)

    # Pack [organism (as float value), pH, temperature, 0] into one (B_pad, 4)
    # f32 input: one small DMA per tile instead of three.
    packed = jnp.stack([organism.astype(jnp.float32),
                        ph.astype(jnp.float32),
                        temperature.astype(jnp.float32),
                        jnp.zeros((B,), jnp.float32)], axis=-1)
    if b_pad != B:
        packed = jnp.pad(packed, ((0, b_pad - B), (0, 0)))

    kernel = functools.partial(_aux_encoder_kernel,
                               cph_count=int(fused["cph"]),
                               bias_lane=int(fused["bias_lane"]))

    resident = lambda shape: pl.BlockSpec(shape, lambda i: (0, 0))

    # VMEM budget: resident weights/centers (double-buffered by default),
    # double-buffered lane-padded batch tiles, in-kernel temporaries.
    e_lanes = _round_up(E, 128)
    resident_bytes = 2 * ((v_pad + c_all) * e_lanes * w_itemsize
                          + 2 * 8 * c_all * 4)
    io_bytes = 2 * (tb * 128 * 4 + tb * e_lanes * 4)
    scratch_bytes = tb * (v_pad * w_itemsize + 4 * c_all * 4
                          + c_all * w_itemsize + 2 * e_lanes * 4)
    need = resident_bytes + io_bytes + scratch_bytes
    cap = 48 * 2 ** 20                      # always below v7x's 64 MiB physical
    try:
        cap_hw = int(getattr(pltpu.get_tpu_info(), "vmem_capacity_bytes", 0))
        if cap_hw > 0:
            cap = min(cap, (cap_hw * 3) // 4)
    except Exception:
        pass
    vmem_limit = int(min(cap, max(16 * 2 ** 20, (3 * need) // 2)))

    cost = pl.CostEstimate(
        flops=int(2 * b_pad * (v_pad + c_all) * E),
        transcendentals=int(b_pad * c_all),
        bytes_accessed=int(b_pad * 4 * 4 + b_pad * E * 4
                           + (v_pad + c_all) * E * w_itemsize + 2 * c_all * 4),
    )

    out = pl.pallas_call(
        kernel,
        out_shape=jax.ShapeDtypeStruct((b_pad, E), jnp.float32),
        grid=grid,
        in_specs=[pl.BlockSpec((tb, 4), lambda i: (i, 0)),
                  resident((1, c_all)),          # fused centers
                  resident((1, c_all)),          # per-lane gamma
                  resident((v_pad, E)),          # one-hot segment weight (+bias row)
                  resident((c_all, E))],         # fused RBF segment weight
        out_specs=pl.BlockSpec((tb, E), lambda i: (i, 0)),
        compiler_params=pltpu.CompilerParams(
            dimension_semantics=("parallel",),
            vmem_limit_bytes=vmem_limit),
        cost_estimate=cost,
    )(packed, fused["c"], fused["g"], fused["w_org"], fused["w_rbf"])

    return out if b_pad == B else out[:B]


# ----------------------------------------------------------------------------
# Parameters (raw torch-equivalent layout, then fused/padded kernel layout)
# ----------------------------------------------------------------------------
def make_raw_params(organism_dict_size, embed_size, key):
    """Deterministic synthetic parameters matching the torch module's shapes."""
    k_emb, k_wp, k_bp, k_wt, k_bt = jax.random.split(key, 5)

    # nn.Embedding(organism_dict_size + 1, embed_size): N(0, 1)
    emb = jax.random.normal(k_emb, (organism_dict_size + 1, embed_size),
                            dtype=jnp.float32)

    # RBF centers, as in ConditionFloatRBF
    c_ph = jnp.asarray(np.arange(0, 14, 0.1, dtype=np.float32)).reshape(1, -1)  # (1,140)
    c_t = jnp.asarray(np.arange(0, 100, 1, dtype=np.float32)).reshape(1, -1)    # (1,100)

    # nn.Linear(C, E): uniform(-1/sqrt(C), 1/sqrt(C)); weight stored as (C, E)
    def linear_init(kw, kb, c, e):
        bound = 1.0 / np.sqrt(c)
        w = jax.random.uniform(kw, (c, e), jnp.float32, -bound, bound)
        b = jax.random.uniform(kb, (1, e), jnp.float32, -bound, bound)
        return w, b

    w_ph, b_ph = linear_init(k_wp, k_bp, c_ph.shape[1], embed_size)
    w_t, b_t = linear_init(k_wt, k_bt, c_t.shape[1], embed_size)

    return {"emb": emb, "c_ph": c_ph, "w_ph": w_ph, "b_ph": b_ph,
            "c_t": c_t, "w_t": w_t, "b_t": b_t}


def fuse_params(raw, weight_dtype=jnp.bfloat16, gamma_ph=10.0, gamma_t=10.0):
    """Kernel-ready layout:
       * w_org: (v_pad, E) = embedding rows, plus the pre-summed bias in a
         reserved one-hot lane (v_pad - 1, never a real id).
       * w_rbf: (c_all, E) = [w_ph ; w_t ; zero pad] over a fused 256-lane segment.
       * c / g: (1, c_all) fused center and per-lane gamma rows (edge-padded so
         padded lanes stay finite; their zero weight rows contribute nothing)."""
    emb = raw["emb"]
    V, E = emb.shape
    c_ph, w_ph, b_ph = raw["c_ph"], raw["w_ph"], raw["b_ph"]
    c_t, w_t, b_t = raw["c_t"], raw["w_t"], raw["b_t"]
    C_ph, C_t = c_ph.shape[1], c_t.shape[1]

    v_pad = _round_up(V + 1, 128)          # +1 reserves the bias lane
    bias_lane = v_pad - 1
    c_all = _round_up(C_ph + C_t, 128)

    w_org = jnp.zeros((v_pad, E), jnp.float32)
    w_org = w_org.at[:V].set(emb)
    w_org = w_org.at[bias_lane].set((b_ph + b_t).reshape(E))
    w_org = w_org.astype(weight_dtype)

    w_rbf = jnp.zeros((c_all, E), jnp.float32)
    w_rbf = w_rbf.at[:C_ph].set(w_ph)
    w_rbf = w_rbf.at[C_ph:C_ph + C_t].set(w_t)
    w_rbf = w_rbf.astype(weight_dtype)

    pad_n = c_all - C_ph - C_t
    c_row = jnp.concatenate(
        [c_ph, c_t, jnp.full((1, pad_n), c_t[0, -1], jnp.float32)], axis=1)
    g_row = jnp.concatenate(
        [jnp.full((1, C_ph), float(gamma_ph), jnp.float32),
         jnp.full((1, c_all - C_ph), float(gamma_t), jnp.float32)], axis=1)

    return {"w_org": w_org, "w_rbf": w_rbf, "c": c_row, "g": g_row,
            "e": E, "cph": C_ph, "bias_lane": bias_lane}


# ----------------------------------------------------------------------------
# References
# ----------------------------------------------------------------------------
def reference(organism, ph, temperature, raw, gamma_ph=10.0, gamma_t=10.0):
    """Pure-f32 reference matching the torch module."""
    hp = lax.Precision.HIGHEST
    out = jnp.take(raw["emb"], organism, axis=0)
    rbf_ph = jnp.exp(-gamma_ph * jnp.square(ph.reshape(-1, 1) - raw["c_ph"]))
    out = out + jnp.dot(rbf_ph, raw["w_ph"], precision=hp) + raw["b_ph"]
    rbf_t = jnp.exp(-gamma_t * jnp.square(temperature.reshape(-1, 1) - raw["c_t"]))
    out = out + jnp.dot(rbf_t, raw["w_t"], precision=hp) + raw["b_t"]
    return out


def reference_bf16(organism, ph, temperature, raw, gamma_ph=10.0, gamma_t=10.0):
    """Reference applying the same bf16 quantization of matmul operands / bias."""
    hp = lax.Precision.HIGHEST
    q = lambda a: a.astype(jnp.bfloat16).astype(jnp.float32)
    out = jnp.take(q(raw["emb"]), organism, axis=0)
    rbf_ph = q(jnp.exp(-gamma_ph * jnp.square(ph.reshape(-1, 1) - raw["c_ph"])))
    out = out + jnp.dot(rbf_ph, q(raw["w_ph"]), precision=hp)
    rbf_t = q(jnp.exp(-gamma_t * jnp.square(temperature.reshape(-1, 1) - raw["c_t"])))
    out = out + jnp.dot(rbf_t, q(raw["w_t"]), precision=hp)
    return out + q(raw["b_ph"] + raw["b_t"])


# ----------------------------------------------------------------------------
if __name__ == "__main__":
    organism_dict_size = 16
    embed_size = 32
    B = 8

    key = jax.random.PRNGKey(0)
    k_params, k_org, k_ph, k_t = jax.random.split(key, 4)

    raw = make_raw_params(organism_dict_size, embed_size, k_params)
    fused = fuse_params(raw, weight_dtype=jnp.bfloat16)

    organism = jax.random.randint(k_org, (B,), 0, organism_dict_size + 1,
                                  dtype=jnp.int32)
    ph = jax.random.uniform(k_ph, (B,), jnp.float32, 0.0, 14.0)
    temperature = jax.random.uniform(k_t, (B,), jnp.float32, 0.0, 100.0)

    out = auxiliary_encoder(organism, ph, temperature, fused)
    out = jax.block_until_ready(out)

    # Tight check vs a reference that applies the same bf16 operand quantization.
    ref_q = reference_bf16(organism, ph, temperature, raw)
    np.testing.assert_allclose(np.asarray(out), np.asarray(ref_q),
                               rtol=3e-3, atol=3e-3)

    # Looser check vs the pure-f32 torch-equivalent reference (bf16 weight storage).
    ref = reference(organism, ph, temperature, raw)
    np.testing.assert_allclose(np.asarray(out), np.asarray(ref),
                               rtol=2e-2, atol=2e-2)

    print("KERNEL_OK")
</pallas_src>

<mosaic_0001>
module attributes {stable_mosaic.version = 11 : i64} {
  func.func @_aux_encoder_kernel(%arg0: i32, %arg1: memref<16x4xf32, #tpu.memory_space<vmem>>, %arg2: memref<1x256xf32, #tpu.memory_space<vmem>>, %arg3: memref<1x256xf32, #tpu.memory_space<vmem>>, %arg4: memref<128x32xbf16, #tpu.memory_space<vmem>>, %arg5: memref<256x32xbf16, #tpu.memory_space<vmem>>, %arg6: memref<16x32xf32, #tpu.memory_space<vmem>>) attributes {dimension_semantics = [#tpu.dimension_semantics<parallel>], iteration_bounds = array<i64: 1>, scalar_prefetch = 0 : i64, scratch_operands = 0 : i64, tpu.core_type = #tpu.core_type<tc>, window_params = [{transform_indices = @transform_0, window_bounds = array<i64: 16, 4>}, {pipeline_mode = #tpu.pipeline_mode<synchronous>, transform_indices = @transform_1, window_bounds = array<i64: 1, 256>}, {pipeline_mode = #tpu.pipeline_mode<synchronous>, transform_indices = @transform_2, window_bounds = array<i64: 1, 256>}, {pipeline_mode = #tpu.pipeline_mode<synchronous>, transform_indices = @transform_3, window_bounds = array<i64: 128, 32>}, {pipeline_mode = #tpu.pipeline_mode<synchronous>, transform_indices = @transform_4, window_bounds = array<i64: 256, 32>}, {transform_indices = @transform_5, window_bounds = array<i64: 16, 32>}]} {
    %c0 = arith.constant 0 : index
    %c0_0 = arith.constant 0 : index
    %0 = vector.load %arg1[%c0, %c0_0] : memref<16x4xf32, #tpu.memory_space<vmem>>, vector<16x4xf32>
    %1 = vector.extract_strided_slice %0 {offsets = [0, 0], sizes = [16, 1], strides = [1, 1]} : vector<16x4xf32> to vector<16x1xf32>
    %2 = vector.extract_strided_slice %0 {offsets = [0, 1], sizes = [16, 1], strides = [1, 1]} : vector<16x4xf32> to vector<16x1xf32>
    %3 = vector.extract_strided_slice %0 {offsets = [0, 2], sizes = [16, 1], strides = [1, 1]} : vector<16x4xf32> to vector<16x1xf32>
    %4 = tpu.iota {dimensions = array<i32: 1>} : vector<16x128xi32>
    %5 = arith.sitofp %4 : vector<16x128xi32> to vector<16x128xf32>
    %6 = vector.broadcast %1 : vector<16x1xf32> to vector<16x128xf32>
    %7 = arith.cmpf oeq, %5, %6 : vector<16x128xf32>
    %c127_i32 = arith.constant 127 : i32
    %8 = vector.broadcast %c127_i32 : i32 to vector<16x128xi32>
    %9 = arith.cmpi eq, %4, %8 : vector<16x128xi32>
    %10 = arith.ori %7, %9 : vector<16x128xi1>
    %11 = arith.extui %10 : vector<16x128xi1> to vector<16x128xi32>
    %12 = arith.sitofp %11 : vector<16x128xi32> to vector<16x128xf32>
    %13 = arith.truncf %12 : vector<16x128xf32> to vector<16x128xbf16>
    %14 = tpu.iota {dimensions = array<i32: 1>} : vector<16x256xi32>
    %c140_i32 = arith.constant 140 : i32
    %15 = vector.broadcast %c140_i32 : i32 to vector<16x256xi32>
    %16 = arith.cmpi slt, %14, %15 : vector<16x256xi32>
    %17 = vector.shape_cast %2 : vector<16x1xf32> to vector<16x1xf32>
    %18 = vector.broadcast %17 : vector<16x1xf32> to vector<16x256xf32>
    %19 = vector.shape_cast %3 : vector<16x1xf32> to vector<16x1xf32>
    %20 = vector.broadcast %19 : vector<16x1xf32> to vector<16x256xf32>
    %21 = arith.select %16, %18, %20 : vector<16x256xi1>, vector<16x256xf32>
    %c0_1 = arith.constant 0 : index
    %c0_2 = arith.constant 0 : index
    %22 = vector.load %arg3[%c0_1, %c0_2] : memref<1x256xf32, #tpu.memory_space<vmem>>, vector<1x256xf32>
    %cst = arith.constant 0.000000e+00 : f32
    %23 = vector.broadcast %cst : f32 to vector<1x256xf32>
    %24 = arith.subf %23, %22 : vector<1x256xf32>
    %c0_3 = arith.constant 0 : index
    %c0_4 = arith.constant 0 : index
    %25 = vector.load %arg2[%c0_3, %c0_4] : memref<1x256xf32, #tpu.memory_space<vmem>>, vector<1x256xf32>
    %26 = vector.broadcast %25 : vector<1x256xf32> to vector<16x256xf32>
    %27 = arith.subf %21, %26 : vector<16x256xf32>
    %28 = arith.mulf %27, %27 : vector<16x256xf32>
    %29 = vector.broadcast %24 : vector<1x256xf32> to vector<16x256xf32>
    %30 = arith.mulf %29, %28 : vector<16x256xf32>
    %31 = math.exp %30 : vector<16x256xf32>
    %c0_5 = arith.constant 0 : index
    %c0_6 = arith.constant 0 : index
    %32 = vector.load %arg4[%c0_5, %c0_6] : memref<128x32xbf16, #tpu.memory_space<vmem>>, vector<128x32xbf16>
    %cst_7 = arith.constant dense<0.000000e+00> : vector<16x32xf32>
    %33 = tpu.matmul %13, %32, %cst_7 {dimension_numbers = #tpu.dot_dimension_numbers<[1], [0], [0], [1], [0, 0, 1, 1], [], []>} : vector<16x128xbf16>, vector<128x32xbf16>, vector<16x32xf32> -> vector<16x32xf32>
    %34 = arith.truncf %31 : vector<16x256xf32> to vector<16x256xbf16>
    %c0_8 = arith.constant 0 : index
    %c0_9 = arith.constant 0 : index
    %35 = vector.load %arg5[%c0_8, %c0_9] : memref<256x32xbf16, #tpu.memory_space<vmem>>, vector<256x32xbf16>
    %cst_10 = arith.constant dense<0.000000e+00> : vector<16x32xf32>
    %36 = tpu.matmul %34, %35, %cst_10 {dimension_numbers = #tpu.dot_dimension_numbers<[1], [0], [0], [1], [0, 0, 1, 1], [], []>} : vector<16x256xbf16>, vector<256x32xbf16>, vector<16x32xf32> -> vector<16x32xf32>
    %37 = arith.addf %33, %36 : vector<16x32xf32>
    %c0_11 = arith.constant 0 : index
    %c0_12 = arith.constant 0 : index
    %38 = vector.load %arg6[%c0_11, %c0_12] : memref<16x32xf32, #tpu.memory_space<vmem>>, vector<16x32xf32>
    tpu.vector_store %arg6[%c0_11, %c0_12], %37 {strides = array<i32>} : memref<16x32xf32, #tpu.memory_space<vmem>>, vector<16x32xf32>,
    return
  }
  func.func @transform_0(%arg0: i32) -> (i32, i32) {
    %c0_i32 = arith.constant 0 : i32
    %c0_i32_0 = arith.constant 0 : i32
    return %arg0, %c0_i32 : i32, i32
  }
  func.func @transform_1(%arg0: i32) -> (i32, i32) {
    %c0_i32 = arith.constant 0 : i32
    %c0_i32_0 = arith.constant 0 : i32
    %c0_i32_1 = arith.constant 0 : i32
    return %c0_i32, %c0_i32_0 : i32, i32
  }
  func.func @transform_2(%arg0: i32) -> (i32, i32) {
    %c0_i32 = arith.constant 0 : i32
    %c0_i32_0 = arith.constant 0 : i32
    %c0_i32_1 = arith.constant 0 : i32
    return %c0_i32, %c0_i32_0 : i32, i32
  }
  func.func @transform_3(%arg0: i32) -> (i32, i32) {
    %c0_i32 = arith.constant 0 : i32
    %c0_i32_0 = arith.constant 0 : i32
    %c0_i32_1 = arith.constant 0 : i32
    return %c0_i32, %c0_i32_0 : i32, i32
  }
  func.func @transform_4(%arg0: i32) -> (i32, i32) {
    %c0_i32 = arith.constant 0 : i32
    %c0_i32_0 = arith.constant 0 : i32
    %c0_i32_1 = arith.constant 0 : i32
    return %c0_i32, %c0_i32_0 : i32, i32
  }
  func.func @transform_5(%arg0: i32) -> (i32, i32) {
    %c0_i32 = arith.constant 0 : i32
    %c0_i32_0 = arith.constant 0 : i32
    return %arg0, %c0_i32 : i32, i32
  }
}

</mosaic_0001>

<bundles_post_ra>
// kernel: tpu_custom_call.1
= control target key start
LH: loop header
LB: loop body
LE: loop exit
PB: predicated region body
PF: predicated region fallthrough
CT: control target
= control target key end

     0   :  { %v528_v2 = vmov 2   ;;  %v529_v3 = vmov 1   ;;  %s654_s0 = inlined_call_operand.vmem [shape: f32[16,4], index: 0, kind: input, shape index: {}]   ;;  %s655_s1 = inlined_call_operand.vmem [shape: f32[1,256], index: 1, kind: input, shape index: {}]   ;;  %s656_s2 = inlined_call_operand.vmem [shape: f32[1,256], index: 2, kind: input, shape index: {}]   ;;  %s657_s3 = inlined_call_operand.vmem [shape: bf16[128,32], index: 3, kind: input, shape index: {}]   ;;  %s658_s4 = inlined_call_operand.vmem [shape: bf16[256,32], index: 4, kind: input, shape index: {}]   ;;  %s659_s5 = inlined_call_operand.hbm [shape: f32[16,32], index: 5, kind: output, shape index: {}]  }
   0x1   :  { %v21_v0 = vld [vmem:[%s654_s0] sm:$0xff]  ;;  %v466_v1 = vld [vmem:[%s657_s3 + $0x38] sm:$0xff]  ;;  %491 = vset.pattern.permute.xlu1 %v528_v2  ;;  %490 = vset.pattern.permute.xlu0 %v529_v3 }
   0x2   :  { %58 = vperm.xlu1 %491, %v21_v0   ;;  %50 = vperm.xlu0 %490, %v21_v0   ;;  %v474_v4 = vld [vmem:[%s658_s4 + $0x38] sm:$0xff] }
   0x3   :  { %10 = vsyncpa [#allocation3], 0  ;;  %v530_v5 = vmov 0   ;;  %324 = vmatpush.bf16.msra.mxu2 %v466_v1  ;;  %v465_v6 = vld [vmem:[%s657_s3 + $0x30] sm:$0xff]  ;;  %248 = vmatpush.bf16.msra.mxu0 %v474_v4  ;;  %v22_v7 = vld [vmem:[%s654_s0 + $0x8] sm:$0xff]  ;;  %v23_v19 = vlaneseq  ;;  %vm338_vm7 = vcmask 261120  }
   0x4   :  { %492 = vset.pattern.permute.xlu2 %v530_v5  ;;  %v464_v8 = vld [vmem:[%s657_s3 + $0x28] sm:$0xff]  ;;  %v463_v9 = vld [vmem:[%s657_s3 + $0x20] sm:$0xff]  ;;  %v462_v10 = vld [vmem:[%s657_s3 + $0x18] sm:$0xff]  ;;  %v531_v34 = vmov 1.0|1.0   ;;  %s347_s22 = sshll.u32 %s659_s5, 4  ;;  %s348_s22 = int_to_ptr.hbm [resolvable:$true] %s347_s22 }
   0x5   :  { %28 = vperm.xlu2 %492, %v21_v0   ;;  %v482_v11 = vld [vmem:[%s658_s4 + $0x78] sm:$0xff]  ;;  %v461_v12 = vld [vmem:[%s657_s3 + $0x10] sm:$0xff]  ;;  %v460_v15 = vld [vmem:[%s657_s3 + $0x8] sm:$0xff]  ;;  %v24_v22 = vand.u32 127, %v23_v19  ;;  %s533_s23 = smov 128   ;;  %s534_s24 = smov 8  }
   0x6   :  { %v473_v13 = vld [vmem:[%s658_s4 + $0x30] sm:$0xff]  ;;  %262 = vmatpush.bf16.msra.mxu1 %v482_v11  ;;  %v472_v16 = vld [vmem:[%s658_s4 + $0x28] sm:$0xff]  ;;  %v459_v18 = vld [vmem:[%s657_s3] sm:$0xff] }
   0x7   :  { %325 = vmatpush.bf16.msra.mxu2 %v465_v6  ;;  %v481_v14 = vld [vmem:[%s658_s4 + $0x70] sm:$0xff]  ;;  %249 = vmatpush.bf16.msra.mxu0 %v473_v13  ;;  %v480_v17 = vld [vmem:[%s658_s4 + $0x68] sm:$0xff]  ;;  %v471_v20 = vld [vmem:[%s658_s4 + $0x20] sm:$0xff]  ;;  %v25_v26 = vcvt.s32.f32 %v24_v22  ;;  %vm38_vm0 = vcmp.eq.s32.totalorder %v24_v22, 127  ;;  %v46_v35 = vadd.s32 128, %v24_v22 }
   0x8   :  { %v479_v21 = vld [vmem:[%s658_s4 + $0x60] sm:$0xff]  ;;  %v470_v23 = vld [vmem:[%s658_s4 + $0x18] sm:$0xff]  ;;  %v469_v27 = vld [vmem:[%s658_s4 + $0x10] sm:$0xff] }
   0x9   :  { %v478_v25 = vld [vmem:[%s658_s4 + $0x58] sm:$0xff]  ;;  %v477_v28 = vld [vmem:[%s658_s4 + $0x50] sm:$0xff]  ;;  %v468_v29 = vld [vmem:[%s658_s4 + $0x8] sm:$0xff]  ;;  %vm48_vm6 = vcmp.lt.s32.totalorder %v46_v35, 140 }
   0xa   :  { %62 = vperm.xlu1 %491, %v22_v7   ;;  %54 = vperm.xlu0 %490, %v22_v7   ;;  %v476_v31 = vld [vmem:[%s658_s4 + $0x48] sm:$0xff]  ;;  %v467_v32 = vld [vmem:[%s658_s4] sm:$0xff] }
   0xb   :  { %326 = vmatpush.bf16.msra.mxu2 %v464_v8  ;;  %263 = vmatpush.bf16.msra.mxu1 %v481_v14  ;;  %v475_v33 = vld [vmem:[%s658_s4 + $0x40] sm:$0xff] }
   0xc   :  { %250 = vmatpush.bf16.msra.mxu0 %v472_v16  ;;  %v71_v36 = vld [vmem:[%s655_s1] sm:$0x3]  ;;  %s532_s1 = smov [#allocation2]  }
   0xd   :  { %33 = vperm.xlu2 %492, %v22_v7   ;;  %v69_v37 = vld [vmem:[%s656_s2] sm:$0x3]  ;;  %v73_v38 = vperm.slane %v71_v36, 0  ;;  %v74_v39 = vperm.slane %v71_v36, 1  ;;  %s345_s2 = sshll.u32 %s532_s1, 4  ;;  %s346_s2 = int_to_ptr.vmem [resolvable:$true] %s345_s2 }
   0xe   :  { %v70_v40 = vsub.f32 0.0, %v69_v37 }
   0xf   :  { %327 = vmatpush.bf16.msra.mxu2 %v463_v9  ;;  %264 = vmatpush.bf16.msra.mxu1 %v480_v17 }
  0x10   :  { %251 = vmatpush.bf16.msra.mxu0 %v471_v20  ;;  %v86_v46 = vperm.slane %v70_v40, 0  ;;  %v87_v48 = vperm.slane %v70_v40, 1 }
  0x12   :  { %493 = vset.pattern.permute.xlu0 %v528_v2 }
  0x13   :  { %328 = vmatpush.bf16.msra.mxu2 %v462_v10  ;;  %265 = vmatpush.bf16.msra.mxu1 %v479_v21 }
  0x14   :  { %252 = vmatpush.bf16.msra.mxu0 %v470_v23 }
  0x17   :  { %329 = vmatpush.bf16.msra.mxu2 %v461_v12  ;;  %266 = vmatpush.bf16.msra.mxu1 %v478_v25 }
  0x18   :  { %253 = vmatpush.bf16.msra.mxu0 %v469_v27 }
  0x1b   :  { %330 = vmatpush.bf16.msra.mxu2 %v460_v15  ;;  %267 = vmatpush.bf16.msra.mxu1 %v477_v28 }
  0x1c   :  { %254 = vmatpush.bf16.msra.mxu0 %v468_v29 }
  0x1f   :  { %331 = vmatpush.bf16.msra.mxu2 %v459_v18  ;;  %268 = vmatpush.bf16.msra.mxu1 %v476_v31 }
  0x20   :  { %255 = vmatpush.bf16.msra.mxu0 %v467_v32 }
  0x23   :  { %269 = vmatpush.bf16.msra.mxu1 %v475_v33 }
  0x5f   :  { %v29_v24 = vpop.permute.xlu2 %28 }
  0x60   :  { %vm36_vm1 = vcmp.eq.f32.partialorder %v25_v26, %v29_v24 }
  0x61   :  { %vm39_vm2 = vmor %vm36_vm1, %vm38_vm0 }
  0x67   :  { %v34_v30 = vpop.permute.xlu2 %33 }
  0x68   :  { %vm37_vm3 = vcmp.eq.f32.partialorder %v25_v26, %v34_v30 }
  0x69   :  { %vm40_vm4 = vmor %vm37_vm3, %vm38_vm0 }
  0x6a   :  { %vm457_vm5 = vmpackc.low %vm40_vm4, %vm39_vm2 }
  0x6b   :  { %458 = vmatmul.msk.bf16.vlgmr.msra.gmra.mxu2 %vm457_vm5, %v531_v34 }
  0x74   :  { %v59_v41 = vpop.permute.xlu1 %58  ;;  %v51_v42 = vpop.permute.xlu0 %50 }
  0x75   :  { %v66_v43 = vsel %vm48_vm6, %v51_v42, %v59_v41  ;;  %v77_v44 = vsub.f32 %v51_v42, %v73_v38 }
  0x76   :  { %v78_v45 = vsub.f32 %v66_v43, %v74_v39 }
  0x77   :  { %v81_v47 = vmul.f32 %v77_v44, %v77_v44 }
  0x78   :  { %v82_v49 = vmul.f32 %v78_v45, %v78_v45 }
  0x79   :  { %v90_v50 = vmul.f32 %v86_v46, %v81_v47 }
  0x7a   :  { %v91_v51 = vmul.f32 %v87_v48, %v82_v49 }
  0x7b   :  { %v94_v57 = vmul.f32 1.442695, %v90_v50 }
  0x7c   :  { %v63_v52 = vpop.permute.xlu1 %62  ;;  %v55_v53 = vpop.permute.xlu0 %54  ;;  %v96_v59 = vmul.f32 1.442695, %v91_v51 }
  0x7d   :  { %v68_v54 = vsel %vm48_vm6, %v55_v53, %v63_v52  ;;  %v79_v55 = vsub.f32 %v55_v53, %v73_v38  ;;  %494 = vpow2.f32 %v94_v57 }
  0x7e   :  { %v80_v56 = vsub.f32 %v68_v54, %v74_v39  ;;  %496 = vpow2.f32 %v96_v59 }
  0x7f   :  { %v83_v58 = vmul.f32 %v79_v55, %v79_v55 }
  0x80   :  { %v84_v60 = vmul.f32 %v80_v56, %v80_v56 }
  0x81   :  { %v92_v61 = vmul.f32 %v86_v46, %v83_v58 }
  0x82   :  { %v93_v62 = vmul.f32 %v87_v48, %v84_v60 }
  0x83   :  { %v98_v63 = vmul.f32 1.442695, %v92_v61  ;;  %v495_v1 = vpop.eup %494 }
  0x84   :  { %v100_v0 = vmul.f32 1.442695, %v93_v62  ;;  %v497_v2 = vpop.eup %496 }
  0x85   :  { %498 = vpow2.f32 %v98_v63 }
  0x86   :  { %500 = vpow2.f32 %v100_v0 }
  0x8b   :  { %v499_v3 = vpop.eup %498 }
  0x8c   :  { %v501_v4 = vpop.eup %500  ;;  %v118_v5 = vpack.c.bf16 %v499_v3, %v495_v1 }
  0x8d   :  { %v119_v6 = vpack.c.bf16 %v501_v4, %v497_v2 }
  0x8e   :  { %256 = vmatmul.bf16.vlgmr.msra.gmra.mxu0 %v118_v5 }
  0x8f   :  { %270 = vmatmul.bf16.vlgmr.msra.gmra.mxu1 %v119_v6 }
  0xee   :  { %v333_v8 = vpop.f32.mrf.mxu2 }
  0xf6   :  { %v335_v15 = vpop.f32.mrf.mxu2 }
 0x10b   :  { %v257_v7 = vpop.f32.mrf.mxu0 }
 0x10c   :  { %v271_v9 = vpop.f32.mrf.mxu1 }
 0x10d   :  { %v272_v10 = vadd.f32 %v271_v9, %v257_v7 }
 0x10f   :  { %v334_v11 = vadd.f32 %v333_v8, %v272_v10 }
 0x111   :  { %339 = vst.msk [vmem:[#allocation2] sm:$0xff] %vm338_vm7, %v334_v11 }
 0x113   :  { %v259_v12 = vpop.f32.mrf.mxu0 }
 0x114   :  { %v273_v13 = vpop.f32.mrf.mxu1 }
 0x115   :  { %v274_v14 = vadd.f32 %v273_v13, %v259_v12 }
 0x117   :  { %v336_v16 = vadd.f32 %v335_v15, %v274_v14 }
 0x119   :  { %340 = vst.msk [vmem:[#allocation2 + $0x8] sm:$0xff] %vm338_vm7, %v336_v16 }
 0x11a   :  { %353 = dma.vmem_to_hbm [thread:$0]  %s346_s2, 256, %s348_s22, [#allocation3], %s533_s23, %s533_s23, %s534_s24  }
 0x11b   :  { %526 = dma.done.wait [#allocation3], 256  }
 0x11c   :  { %527 = vsyncadd [#allocation3], 4294967040 }
 0x11d   :  { %358 = vsyncpa [#allocation3], 1 }

</bundles_post_ra>
